<compile_context>
chip_gen: v7x
topology: tpu7x:2x2x1
jax: 0.10.0
libtpu: 0.0.40
codegen_flags: <defaults>
</compile_context>

<pallas_src>
import jax
import jax.numpy as jnp
from jax.experimental import pallas as pl
from jax.experimental.pallas import tpu as pltpu


def _round_up(x: int, m: int) -> int:
    return ((x + m - 1) // m) * m


def _cdiv(a: int, b: int) -> int:
    return (a + b - 1) // b


def _make_kernel(batch_size: int, tile_b: int):
    """Kernel closure over the static batch size / tile size (for tail masking)."""

    def kernel(pred_ref, log_spc_ref, labels_ref, out_ref):
        i = pl.program_id(0)

        pred = pred_ref[...].astype(jnp.float32)        # (tile_b, C) f32 compute
        log_spc = log_spc_ref[...]                      # (1, C) f32, VMEM-resident
        labels = labels_ref[...]                        # (tile_b, 1) int32

        logits = pred + log_spc                         # broadcast over batch

        # Gather the target-class logit via one-hot select (no dynamic gather).
        # iota kept as a single (1, C) row; computed right after logits so the
        # f32 logits tile does not stay live across the whole body.
        # TODO(synk): out-of-range labels silently yield picked=0 (loss = lse)
        # rather than raising like torch.nn.functional.cross_entropy.
        col = jax.lax.broadcasted_iota(jnp.int32, (1, logits.shape[-1]), 1)
        picked = jnp.sum(jnp.where(col == labels, logits, 0.0),
                         axis=-1, keepdims=True)        # (tile_b, 1)

        # Numerically stable log-sum-exp along the class (lane) axis.
        m = jnp.max(logits, axis=-1, keepdims=True)
        lse = m + jnp.log(jnp.sum(jnp.exp(logits - m), axis=-1, keepdims=True))

        loss = lse - picked                             # (tile_b, 1) per-example

        # Mask tail rows of the (unpadded) last block: those rows read garbage
        # from the out-of-bounds part of the block and must not contaminate
        # the partial sum (jnp.where select is NaN-safe).
        row = jax.lax.broadcasted_iota(jnp.int32, (tile_b, 1), 0)
        valid = (i * tile_b + row) < batch_size
        partial = jnp.sum(jnp.where(valid, loss, 0.0), axis=0, keepdims=True)

        out_ref[...] = partial.reshape(1, 1, 1)         # per-tile partial sum

    return kernel


def balanced_softmax_loss(pred, labels, sample_per_class, *, tile_b=None):
    """pred: (B, C) float (any dtype), labels: (B,) int, sample_per_class: (C,)."""
    B, C = pred.shape
    itemsize = jnp.dtype(pred.dtype).itemsize
    sublane = 8 * max(1, 4 // itemsize)                 # 8 f32 / 16 bf16 / 32 int8

    # log(spc) once (tiny XLA op); stays resident in VMEM across all grid steps.
    log_spc = jnp.log(sample_per_class.astype(jnp.float32)).reshape(1, C)
    labels2d = labels.astype(jnp.int32).reshape(B, 1)

    # Generation-aware VMEM budget: 3/4 of physical VMEM, capped at 96 MiB.
    #   v5e / v6e (128 MiB) -> 96 MiB limit;   v7x (64 MiB / TC) -> 48 MiB limit.
    vmem_cap = 64 * 1024 * 1024                         # conservative fallback (v7x)
    try:
        info = pltpu.get_tpu_info()
        vmem_cap = int(getattr(info, "vmem_capacity_bytes", vmem_cap))
    except Exception:
        pass
    vmem_limit = min(int(vmem_cap) * 3 // 4, 96 * 1024 * 1024)

    if tile_b is None:
        # Per-step footprint ~ tile_b * C * (2*itemsize [double-buffered pred]
        # + ~12 B [f32 logits + exp / select temps]).  Keep it under the limit
        # with headroom.
        budget = max(8 * 1024 * 1024, vmem_limit - 8 * 1024 * 1024)
        per_row = C * (2 * itemsize + 12)
        tile_b = max(sublane, budget // max(1, per_row))
    # TODO(synk): for vocab-scale C (tile_b collapsing toward one sublane group)
    # a second grid axis over C with an online logsumexp would be needed.

    tile_b = _round_up(max(int(tile_b), 1), sublane)
    tile_b = min(tile_b, _round_up(B, sublane))
    if B > sublane:
        # Megacore: guarantee >= 2 tiles whenever the batch allows it.
        tile_b = min(tile_b, _round_up(_cdiv(B, 2), sublane))
    num_tiles = _cdiv(B, tile_b)

    cost = pl.CostEstimate(
        flops=6 * B * C,
        transcendentals=B * C,
        bytes_accessed=B * C * itemsize + B * 4 + C * 4 + num_tiles * 4,
    )

    per_tile = pl.pallas_call(
        _make_kernel(B, tile_b),
        out_shape=jax.ShapeDtypeStruct((num_tiles, 1, 1), jnp.float32),
        grid_spec=pltpu.PrefetchScalarGridSpec(
            num_scalar_prefetch=0,
            grid=(num_tiles,),
            in_specs=[
                pl.BlockSpec((tile_b, C), lambda i: (i, 0)),   # pred tile (native dtype)
                pl.BlockSpec((1, C), lambda i: (0, 0)),        # log_spc, VMEM-resident
                pl.BlockSpec((tile_b, 1), lambda i: (i, 0)),   # labels tile
            ],
            out_specs=pl.BlockSpec((1, 1, 1), lambda i: (i, 0, 0)),  # partial sums
        ),
        compiler_params=pltpu.CompilerParams(
            dimension_semantics=("parallel",),                 # independent batch tiles
            vmem_limit_bytes=vmem_limit,
        ),
        cost_estimate=cost,
    )(pred, log_spc, labels2d)

    # Tiny final reduction: num_tiles scalars -> mean over exactly B examples.
    return jnp.sum(per_tile) / B


def _reference(pred, labels, sample_per_class):
    # pure-JAX reference for sanity checking
    logits = pred.astype(jnp.float32) + jnp.log(
        sample_per_class.astype(jnp.float32))[None, :]
    lse = jax.nn.logsumexp(logits, axis=-1)
    picked = jnp.take_along_axis(logits, labels[:, None], axis=-1)[:, 0]
    return jnp.mean(lse - picked)


if __name__ == "__main__":
    key = jax.random.PRNGKey(0)
    C = 10  # num_classes=10 as in the module default
    k1, k2, k3, k4, k5, k6, k7 = jax.random.split(key, 7)

    sample_per_class = jax.random.randint(k3, (C,), 1, 100, dtype=jnp.int32)

    # case 1: f32, single tile
    B1 = 8
    pred1 = jax.random.normal(k1, (B1, C), dtype=jnp.float32)
    labels1 = jax.random.randint(k2, (B1,), 0, C, dtype=jnp.int32)
    loss1 = jax.block_until_ready(
        balanced_softmax_loss(pred1, labels1, sample_per_class))
    ref1 = _reference(pred1, labels1, sample_per_class)
    assert jnp.allclose(loss1, ref1, rtol=1e-5, atol=1e-5), (loss1, ref1)

    # case 2: bf16 pred fed straight through, multi-tile grid (3 tiles of 16)
    B2 = 48
    pred2 = jax.random.normal(k4, (B2, C), dtype=jnp.bfloat16)
    labels2 = jax.random.randint(k5, (B2,), 0, C, dtype=jnp.int32)
    loss2 = jax.block_until_ready(
        balanced_softmax_loss(pred2, labels2, sample_per_class, tile_b=16))
    ref2 = _reference(pred2.astype(jnp.float32), labels2, sample_per_class)
    assert jnp.allclose(loss2, ref2, rtol=1e-4, atol=1e-4), (loss2, ref2)

    # case 3: ragged batch (B % tile_b != 0) -> exercises the in-kernel tail mask
    B3 = 20
    pred3 = jax.random.normal(k6, (B3, C), dtype=jnp.float32)
    labels3 = jax.random.randint(k7, (B3,), 0, C, dtype=jnp.int32)
    loss3 = jax.block_until_ready(
        balanced_softmax_loss(pred3, labels3, sample_per_class, tile_b=16))
    ref3 = _reference(pred3, labels3, sample_per_class)
    assert jnp.allclose(loss3, ref3, rtol=1e-5, atol=1e-5), (loss3, ref3)

    print("KERNEL_OK")
</pallas_src>

<mosaic_0001>
module attributes {stable_mosaic.version = 11 : i64} {
  func.func @kernel(%arg0: i32, %arg1: memref<8x10xf32, #tpu.memory_space<vmem>>, %arg2: memref<1x10xf32, #tpu.memory_space<vmem>>, %arg3: memref<8x1xi32, #tpu.memory_space<vmem>>, %arg4: memref<1x1x1xf32, #tpu.memory_space<vmem>>) attributes {dimension_semantics = [#tpu.dimension_semantics<parallel>], iteration_bounds = array<i64: 1>, scalar_prefetch = 0 : i64, scratch_operands = 0 : i64, tpu.core_type = #tpu.core_type<tc>, window_params = [{transform_indices = @transform_0, window_bounds = array<i64: 8, 10>}, {pipeline_mode = #tpu.pipeline_mode<synchronous>, transform_indices = @transform_1, window_bounds = array<i64: 1, 10>}, {transform_indices = @transform_2, window_bounds = array<i64: 8, 1>}, {transform_indices = @transform_3, window_bounds = array<i64: 1, 1, 1>}]} {
    %c0 = arith.constant 0 : index
    %c0_0 = arith.constant 0 : index
    %0 = vector.load %arg1[%c0, %c0_0] : memref<8x10xf32, #tpu.memory_space<vmem>>, vector<8x10xf32>
    %c0_1 = arith.constant 0 : index
    %c0_2 = arith.constant 0 : index
    %1 = vector.load %arg2[%c0_1, %c0_2] : memref<1x10xf32, #tpu.memory_space<vmem>>, vector<1x10xf32>
    %c0_3 = arith.constant 0 : index
    %c0_4 = arith.constant 0 : index
    %2 = vector.load %arg3[%c0_3, %c0_4] : memref<8x1xi32, #tpu.memory_space<vmem>>, vector<8x1xi32>
    %3 = vector.broadcast %1 : vector<1x10xf32> to vector<8x10xf32>
    %4 = arith.addf %0, %3 : vector<8x10xf32>
    %5 = tpu.iota {dimensions = array<i32: 1>} : vector<1x10xi32>
    %6 = vector.broadcast %5 : vector<1x10xi32> to vector<8x10xi32>
    %7 = vector.broadcast %2 : vector<8x1xi32> to vector<8x10xi32>
    %8 = arith.cmpi eq, %6, %7 : vector<8x10xi32>
    %cst = arith.constant 0.000000e+00 : f32
    %9 = vector.broadcast %cst : f32 to vector<8x10xf32>
    %10 = arith.select %8, %4, %9 : vector<8x10xi1>, vector<8x10xf32>
    %cst_5 = arith.constant dense<0.000000e+00> : vector<8xf32>
    %11 = vector.multi_reduction <add>, %10, %cst_5 [1] : vector<8x10xf32> to vector<8xf32>
    %12 = vector.shape_cast %11 : vector<8xf32> to vector<8x1xf32>
    %cst_6 = arith.constant dense<0xFF800000> : vector<8xf32>
    %13 = vector.multi_reduction <maximumf>, %4, %cst_6 [1] : vector<8x10xf32> to vector<8xf32>
    %14 = vector.shape_cast %13 : vector<8xf32> to vector<8x1xf32>
    %15 = vector.broadcast %14 : vector<8x1xf32> to vector<8x10xf32>
    %16 = arith.subf %4, %15 : vector<8x10xf32>
    %17 = math.exp %16 : vector<8x10xf32>
    %cst_7 = arith.constant dense<0.000000e+00> : vector<8xf32>
    %18 = vector.multi_reduction <add>, %17, %cst_7 [1] : vector<8x10xf32> to vector<8xf32>
    %19 = vector.shape_cast %18 : vector<8xf32> to vector<8x1xf32>
    %20 = math.log %19 : vector<8x1xf32>
    %21 = arith.addf %14, %20 : vector<8x1xf32>
    %22 = arith.subf %21, %12 : vector<8x1xf32>
    %23 = tpu.iota {dimensions = array<i32: 0>} : vector<8x1xi32>
    %c8_i32 = arith.constant 8 : i32
    %24 = arith.muli %arg0, %c8_i32 : i32
    %25 = vector.broadcast %24 : i32 to vector<8x1xi32>
    %26 = arith.addi %25, %23 : vector<8x1xi32>
    %c8_i32_8 = arith.constant 8 : i32
    %27 = vector.broadcast %c8_i32_8 : i32 to vector<8x1xi32>
    %28 = arith.cmpi slt, %26, %27 : vector<8x1xi32>
    %cst_9 = arith.constant 0.000000e+00 : f32
    %29 = vector.broadcast %cst_9 : f32 to vector<8x1xf32>
    %30 = arith.select %28, %22, %29 : vector<8x1xi1>, vector<8x1xf32>
    %cst_10 = arith.constant dense<0.000000e+00> : vector<1xf32>
    %31 = vector.multi_reduction <add>, %30, %cst_10 [0] : vector<8x1xf32> to vector<1xf32>
    %32 = vector.shape_cast %31 : vector<1xf32> to vector<1x1xf32>
    %33 = vector.shape_cast %32 : vector<1x1xf32> to vector<1x1x1xf32>
    %c0_11 = arith.constant 0 : index
    %c0_12 = arith.constant 0 : index
    %c0_13 = arith.constant 0 : index
    %34 = vector.load %arg4[%c0_11, %c0_12, %c0_13] : memref<1x1x1xf32, #tpu.memory_space<vmem>>, vector<1x1x1xf32>
    tpu.vector_store %arg4[%c0_11, %c0_12, %c0_13], %33 {strides = array<i32>} : memref<1x1x1xf32, #tpu.memory_space<vmem>>, vector<1x1x1xf32>,
    return
  }
  func.func @transform_0(%arg0: i32) -> (i32, i32) {
    %c0_i32 = arith.constant 0 : i32
    %c0_i32_0 = arith.constant 0 : i32
    return %arg0, %c0_i32 : i32, i32
  }
  func.func @transform_1(%arg0: i32) -> (i32, i32) {
    %c0_i32 = arith.constant 0 : i32
    %c0_i32_0 = arith.constant 0 : i32
    %c0_i32_1 = arith.constant 0 : i32
    return %c0_i32, %c0_i32_0 : i32, i32
  }
  func.func @transform_2(%arg0: i32) -> (i32, i32) {
    %c0_i32 = arith.constant 0 : i32
    %c0_i32_0 = arith.constant 0 : i32
    return %arg0, %c0_i32 : i32, i32
  }
  func.func @transform_3(%arg0: i32) -> (i32, i32, i32) {
    %c0_i32 = arith.constant 0 : i32
    %c0_i32_0 = arith.constant 0 : i32
    %c0_i32_1 = arith.constant 0 : i32
    return %arg0, %c0_i32, %c0_i32_0 : i32, i32, i32
  }
}

</mosaic_0001>

<bundles_post_ra>
// kernel: tpu_custom_call.1
= control target key start
LH: loop header
LB: loop body
LE: loop exit
PB: predicated region body
PF: predicated region fallthrough
CT: control target
= control target key end

     0   :  { %vm32_vm0 = vcmask 80896   ;;  %v110_v3 = vmov 0   ;;  %s156_s0 = inlined_call_operand.vmem [shape: f32[8,10], index: 0, kind: input, shape index: {}]   ;;  %s157_s1 = inlined_call_operand.vmem [shape: f32[1,10], index: 1, kind: input, shape index: {}]   ;;  %s158_s2 = inlined_call_operand.vmem [shape: s32[8,1], index: 2, kind: input, shape index: {}]   ;;  %s159_s3 = inlined_call_operand.hbm [shape: f32[1,1,1], index: 3, kind: output, shape index: {}]  }
   0x1   :  { %v15_v0 = vld [vmem:[%s156_s0] sm:$0xff]  ;;  %81 = vset.pattern.permute.xlu0 %v110_v3 }
   0x2   :  { %v78_v1 = vld [vmem:[%s157_s1] ss:$0 sm:$0xff] }
   0x3   :  { %v24_v2 = vadd.f32 %v78_v1, %v15_v0 }
   0x4   :  { %8 = vsyncpa [#allocation3], 0  ;;  %v17_v5 = vld [vmem:[%s158_s2] sm:$0xff]  ;;  %v25_v9 = vlaneseq  ;;  %s111_s0 = smov [#allocation2]   ;;  %vm62_vm2 = vcmask 0  }
   0x5   :  { %v36_v4 = vsel %vm32_vm0, %v24_v2, -inf  ;;  %s70_s1 = sshll.u32 %s111_s0, 4  ;;  %s71_s1 = int_to_ptr.vmem [resolvable:$true] %s70_s1 }
   0x6   :  { %37 = vmax.xlane.f32.xlu0 %v36_v4  ;;  %v26_v10 = vand.u32 127, %v25_v9  ;;  %s86_s2 = scalar_lea.vmem %s71_s1, 16  ;;  %s90_s18 = scalar_lea.vmem %s71_s1, 32 }
   0x7   :  { %p87_p0 = scmp.ne.s32.totalorder %s71_s1, %s86_s2  ;;  %p91_p1 = scmp.lt.s32.totalorder %s71_s1, %s71_s1 }
   0x8   :  { %p92_p2 = scmp.lt.s32.totalorder %s90_s18, %s86_s2 }
   0xa   :  { %p93_p3 = por %p92_p2, %p91_p1 }
   0xc   :  { %p94_p4 = pnand %p93_p3, %p87_p0 }
  0x1c   :  { %28 = vperm.xlu0 %81, %v17_v5  }
  0x93   :  { %v38_v6 = vpop.xlane.xlu0 %37 }
  0x94   :  { %v39_v7 = vsub.f32 %v24_v2, %v38_v6 }
  0x96   :  { %v40_v8 = vmul.f32 1.442695, %v39_v7 }
  0x98   :  { %82 = vpow2.f32 %v40_v8 }
  0x9b   :  { %v29_v11 = vpop.permute.xlu0 %28 }
  0x9c   :  { %vm30_vm1 = vcmp.eq.s32.totalorder %v26_v10, %v29_v11 }
  0x9d   :  { %v31_v13 = vsel %vm30_vm1, %v24_v2, 0.0 }
  0x9e   :  { %v33_v15 = vsel %vm32_vm0, %v31_v13, 0.0 }
  0xa2   :  { %v83_v12 = vpop.eup %82 }
  0xa3   :  { %v42_v14 = vsel %vm32_vm0, %v83_v12, 0.0 }
  0xa4   :  { %43 = vadd.xlane.f32.xlu1 %v42_v14 }
  0xa8   :  { %34 = vadd.xlane.f32.xlu1 %v33_v15 }
 0x131   :  { %v44_v16 = vpop.xlane.xlu1 %43 }
 0x132   :  { %84 = vlog2.f32 %v44_v16 }
 0x135   :  { %v35_v19 = vpop.xlane.xlu1 %34 }
 0x13c   :  { %v85_v17 = vpop.eup %84 }
 0x13d   :  { %v46_v18 = vmul.f32 0.6931472, %v85_v17 }
 0x13f   :  { %v47_v20 = vadd.f32 %v46_v18, %v38_v6 }
 0x141   :  { %v48_v21 = vsub.f32 %v47_v20, %v35_v19 }
 0x143   :  { %v56_v22 = vrot.slane %v48_v21, 4 }
 0x145   :  { %v57_v23 = vadd.f32 %v56_v22, %v48_v21 }
 0x147   :  { %v58_v24 = vrot.slane %v57_v23, 2 }
 0x149   :  { %v59_v25 = vadd.f32 %v58_v24, %v57_v23 }
 0x14b   :  { %v60_v26 = vrot.slane %v59_v25, 1 }
 0x14d   :  { %v61_v27 = vadd.f32 %v60_v26, %v59_v25 }
 0x14f   :  { %63 = vst.msk [vmem:[#allocation2] sm:$0x1] %vm62_vm2, %v61_v27 }
 0x150   :  { %97 = shalt.err (!%p94_p4)
}
 0x151   :  { %s98_s21 = scalar_lea.hbm %s159_s3, 16 }
 0x152   :  { %p99_p5 = scmp.ne.s32.totalorder %s159_s3, %s98_s21  ;;  %p102_p6 = scmp.lt.u32.totalorder %s98_s21, %s159_s3 }
 0x154   :  { %p104_p7 = pnand %p102_p6, %p99_p5 }
 0x156   :  { %107 = shalt.err (!%p104_p7)
}
 0x157   :  { %73 = dma.vmem_to_hbm [thread:$0]  %s71_s1, 16, %s159_s3, [#allocation3]  }
 0x158   :  { %108 = dma.done.wait [#allocation3], 16  }
 0x159   :  { %109 = vsyncadd [#allocation3], 4294967280 }
 0x15a   :  { %77 = vsyncpa [#allocation3], 1 }

</bundles_post_ra>
